<compile_context>
chip_gen: v7x
topology: tpu7x:2x2x1
jax: 0.10.0
libtpu: 0.0.40
codegen_flags: <defaults>
</compile_context>

<pallas_src>
import jax
import jax.numpy as jnp
from jax.experimental import pallas as pl
from jax.experimental.pallas import tpu as pltpu


def _binarize_kernel(x_ref, o_ref):
    # One compare + one select in the native dtype (no f32 widening): +/-1 is
    # exact in every float dtype, and staying narrow halves/quarters vreg
    # pressure for bf16 / int8 inputs.  NOTE: keep the compare+select form —
    # a sign-bit / copysign trick would flip -0.0 to -1.
    x = x_ref[...]
    one = jnp.ones((), dtype=o_ref.dtype)
    o_ref[...] = jnp.where(x >= 0, one, -one)


# ~4 MiB per block: near the measured ~86% HBM-roofline plateau; with double
# buffering (2x in + 2x out = 16 MiB live) it fits every generation's VMEM.
_TARGET_BLOCK_BYTES = 4 * 1024 * 1024


def _round_up(v: int, m: int) -> int:
    return -(-v // m) * m


def _choose_lanes(n_main: int) -> int:
    """Lane-dense width (multiple of 128) that divides n_main exactly."""
    for lanes in (1024, 512, 256, 128):
        if n_main % lanes == 0:
            return lanes
    return 128  # unreachable: n_main is always a multiple of 128


def _vmem_limit_bytes() -> int:
    # 48 MiB works everywhere: it overrides v5e's 16 MiB scoped default (which
    # the 4 MiB double-buffered in+out exactly fills) and stays well under
    # v7x's 64 MiB physical VMEM.  When the hardware is queryable, cap at ~3/4
    # of physical so future block-size bumps validated on v6e can't OOM v7x.
    limit = 48 * 1024 * 1024
    try:
        cap = int(pltpu.get_tpu_info().vmem_capacity_bytes)
        limit = min(limit, max(32 * 1024 * 1024, (cap * 3) // 4))
    except Exception:
        pass
    return limit


def _binarize_2d(x2d: jax.Array) -> jax.Array:
    """Run the kernel over a lane-dense (rows, lanes) slab (lanes % 128 == 0)."""
    rows, lanes = x2d.shape
    dtype = x2d.dtype
    itemsize = jnp.dtype(dtype).itemsize
    # Row granularity: 8 for f32, 16 for bf16, 32 for int8/fp8 (sublane packing).
    gran = max(8, 32 // itemsize)

    # ~4 MiB row blocks (multiple of `gran`), capped at the full row count.
    block_rows = max(gran, (_TARGET_BLOCK_BYTES // (lanes * itemsize)) // gran * gran)
    if block_rows >= rows:
        block_rows = rows
    grid_rows = pl.cdiv(rows, block_rows)

    # Rebalance tiny grids into >= 2 near-equal "parallel" steps so both of
    # v7x's TensorCores stream data (neutral on single-core v5e/v6e).  Prefer
    # 4 steps (2 per core -> output writeback overlaps the next input fetch),
    # else 2.  Blocks stay multiples of `gran` and near-equal in size.
    if grid_rows < 4 and rows >= 2 * gran:
        for steps in (4, 2):
            cand = _round_up(pl.cdiv(rows, steps), gran)
            if cand < rows and pl.cdiv(rows, cand) == steps:
                block_rows, grid_rows = cand, steps
                break

    n_main = rows * lanes
    cost = pl.CostEstimate(
        flops=2 * n_main,                      # compare + select
        transcendentals=0,
        bytes_accessed=2 * n_main * itemsize,  # one read pass + one write pass
    )

    return pl.pallas_call(
        _binarize_kernel,
        out_shape=jax.ShapeDtypeStruct((rows, lanes), dtype),
        grid_spec=pltpu.PrefetchScalarGridSpec(
            num_scalar_prefetch=0,
            grid=(grid_rows,),
            in_specs=[pl.BlockSpec((block_rows, lanes), lambda i: (i, 0))],
            out_specs=pl.BlockSpec((block_rows, lanes), lambda i: (i, 0)),
        ),
        compiler_params=pltpu.CompilerParams(
            dimension_semantics=("parallel",),
            vmem_limit_bytes=_vmem_limit_bytes(),
        ),
        cost_estimate=cost,
    )(x2d)


@jax.jit
def binarized_forward(x: jax.Array) -> jax.Array:
    """Elementwise binarize: +1 where x >= 0 else -1. Same shape/dtype as x."""
    orig_shape = x.shape
    dtype = x.dtype
    n = int(x.size)
    if n == 0:
        return x  # nothing to do; avoid a zero-sized pallas_call

    one = jnp.ones((), dtype=dtype)
    flat = x.reshape(-1)          # contiguous -> free metadata reshape
    tail = n % 128
    n_main = n - tail

    if n_main == 0:
        # Fewer than 128 elements: a pallas_call cannot pay for itself.
        return jnp.where(flat >= 0, one, -one).reshape(orig_shape)

    lanes = _choose_lanes(n_main)
    rows = n_main // lanes

    if tail == 0:
        # Common path (element count a multiple of 128): no pad/slice/concat;
        # the kernel streams the whole tensor exactly once each way.
        return _binarize_2d(flat.reshape(rows, lanes)).reshape(orig_shape)

    # Ragged path: kernel handles the 128-aligned prefix; the <128-element
    # tail is a scalar-cheap jnp.where stitched on with one concat.  This
    # replaces the previous full-tensor jnp.pad + output-slice round trip.
    main_out = _binarize_2d(flat[:n_main].reshape(rows, lanes)).reshape(-1)
    tail_out = jnp.where(flat[n_main:] >= 0, one, -one)
    return jnp.concatenate([main_out, tail_out]).reshape(orig_shape)

# TODO(synk): BinarizedF.backward (straight-through identity gradient) is not
# implemented here; only the module's forward pass is translated.


if __name__ == "__main__":
    key = jax.random.PRNGKey(0)
    k0, k1, k2 = jax.random.split(key, 3)

    def ref_binarize(v):
        return jnp.where(v >= 0, jnp.ones_like(v), -jnp.ones_like(v))

    # Primary: NCHW conv-style input (batch=2, channels=4, 16x16) -> 2048
    # elements, the 128-aligned fast path.
    x = jax.random.normal(k0, (2, 4, 16, 16), dtype=jnp.float32)
    out = jax.block_until_ready(binarized_forward(x))
    assert out.shape == x.shape and out.dtype == x.dtype
    assert bool(jnp.all(out == ref_binarize(x)))

    # Ragged path: 2*3*7*9 = 378 elements (256-element kernel prefix + 122 tail).
    y = jax.random.normal(k1, (2, 3, 7, 9), dtype=jnp.float32)
    out_y = jax.block_until_ready(binarized_forward(y))
    assert out_y.shape == y.shape and out_y.dtype == y.dtype
    assert bool(jnp.all(out_y == ref_binarize(y)))

    # Dtype-native path for bf16 (no f32 widening inside the kernel).
    z = jax.random.normal(k2, (2, 4, 16, 16), dtype=jnp.bfloat16)
    out_z = jax.block_until_ready(binarized_forward(z))
    assert out_z.shape == z.shape and out_z.dtype == z.dtype
    assert bool(jnp.all(out_z == ref_binarize(z)))

    # Tiny (<128 elements) path.
    w = jax.random.normal(k0, (3, 5), dtype=jnp.float32)
    out_w = jax.block_until_ready(binarized_forward(w))
    assert out_w.shape == w.shape and out_w.dtype == w.dtype
    assert bool(jnp.all(out_w == ref_binarize(w)))

    print("KERNEL_OK")
</pallas_src>

<mosaic_0001>
module attributes {stable_mosaic.version = 11 : i64} {
  func.func @_binarize_kernel(%arg0: i32, %arg1: memref<2x1024xf32, #tpu.memory_space<vmem>>, %arg2: memref<2x1024xf32, #tpu.memory_space<vmem>>) attributes {dimension_semantics = [#tpu.dimension_semantics<parallel>], iteration_bounds = array<i64: 1>, scalar_prefetch = 0 : i64, scratch_operands = 0 : i64, tpu.core_type = #tpu.core_type<tc>, window_params = [{transform_indices = @transform_0, window_bounds = array<i64: 2, 1024>}, {transform_indices = @transform_1, window_bounds = array<i64: 2, 1024>}]} {
    %c0 = arith.constant 0 : index
    %c0_0 = arith.constant 0 : index
    %0 = vector.load %arg1[%c0, %c0_0] : memref<2x1024xf32, #tpu.memory_space<vmem>>, vector<2x1024xf32>
    %cst = arith.constant 0.000000e+00 : f32
    %1 = vector.broadcast %cst : f32 to vector<2x1024xf32>
    %2 = arith.cmpf oge, %0, %1 : vector<2x1024xf32>
    %cst_1 = arith.constant 0.000000e+00 : f32
    %cst_2 = arith.constant 1.000000e+00 : f32
    %3 = arith.subf %cst_1, %cst_2 : f32
    %cst_3 = arith.constant 1.000000e+00 : f32
    %4 = vector.broadcast %cst_3 : f32 to vector<2x1024xf32>
    %5 = vector.broadcast %3 : f32 to vector<2x1024xf32>
    %6 = arith.select %2, %4, %5 : vector<2x1024xi1>, vector<2x1024xf32>
    %c0_4 = arith.constant 0 : index
    %c0_5 = arith.constant 0 : index
    %7 = vector.load %arg2[%c0_4, %c0_5] : memref<2x1024xf32, #tpu.memory_space<vmem>>, vector<2x1024xf32>
    tpu.vector_store %arg2[%c0_4, %c0_5], %6 {strides = array<i32>} : memref<2x1024xf32, #tpu.memory_space<vmem>>, vector<2x1024xf32>,
    return
  }
  func.func @transform_0(%arg0: i32) -> (i32, i32) {
    %c0_i32 = arith.constant 0 : i32
    %c0_i32_0 = arith.constant 0 : i32
    return %arg0, %c0_i32 : i32, i32
  }
  func.func @transform_1(%arg0: i32) -> (i32, i32) {
    %c0_i32 = arith.constant 0 : i32
    %c0_i32_0 = arith.constant 0 : i32
    return %arg0, %c0_i32 : i32, i32
  }
}

</mosaic_0001>

<bundles_post_ra>
// kernel: binarized_forward.1
= control target key start
LH: loop header
LB: loop body
LE: loop exit
PB: predicated region body
PF: predicated region fallthrough
CT: control target
= control target key end

     0   :  { %v21_v2 = vmov -1.0   ;;  %s44_s0 = inlined_call_operand.vmem [shape: f32[2,1024], index: 0, kind: input, shape index: {}]   ;;  %s45_s1 = inlined_call_operand.vmem [shape: f32[2,1024], index: 1, kind: output, shape index: {}]  }
   0x1   :  { %v8_v0 = vld [vmem:[%s44_s0] sm:$0xff]  ;;  %v9_v1 = vld [vmem:[%s44_s0 + $0x8] sm:$0xff] }
   0x2   :  { %vm10_vm0 = vcmp.ge.f32.partialorder %v8_v0, 0.0  ;;  %vm11_vm1 = vcmp.ge.f32.partialorder %v9_v1, 0.0 }
   0x3   :  { %v12_v3 = vsel %vm10_vm0, 1.0, %v21_v2  ;;  %v13_v4 = vsel %vm11_vm1, 1.0, %v21_v2 }
   0x4   :  { %14 = vst [vmem:[%s45_s1] sm:$0xff] %v12_v3  ;;  %15 = vst [vmem:[%s45_s1 + $0x8] sm:$0xff] %v13_v4 }

</bundles_post_ra>
